<compile_context>
chip_gen: v7x
topology: tpu7x:2x2x1
jax: 0.10.0
libtpu: 0.0.40
codegen_flags: <defaults>
</compile_context>

<pallas_src>
import jax
import jax.numpy as jnp
from jax.experimental import pallas as pl
from jax.experimental.pallas import tpu as pltpu

HIDDEN_DIM = 64
# >= 512 rows amortizes the ~0.35us per-grid-step overhead and reaches ~85% of
# the HBM roofline; must stay a multiple of 8 (f32 sublane height). VMEM is not
# the binding constraint at these dims on any generation (incl. v7x's 64 MiB).
_MAX_TILE_B = 512


def _policy_kernel(x_ref, w1_ref, b1_ref, w2_ref, b2_ref, o_ref):
    # Hot path: two matmuls + bias + ReLU + softmax, all fused in VMEM/vregs.
    x = x_ref[...]                                                   # (TB, D_in)
    h = jnp.dot(x, w1_ref[...], preferred_element_type=jnp.float32)  # (TB, 64)
    h = jnp.maximum(h + b1_ref[...], 0.0)                            # bias + ReLU
    logits = jnp.dot(h, w2_ref[...],
                     preferred_element_type=jnp.float32)             # (TB, D_out)
    logits = logits + b2_ref[...]
    # Numerically stable softmax along the last axis; reciprocal on the EUP.
    m = jnp.max(logits, axis=-1, keepdims=True)
    e = jnp.exp(logits - m)
    o_ref[...] = e * pl.reciprocal(jnp.sum(e, axis=-1, keepdims=True), approx=True)


def _round_up(x, m):
    return (x + m - 1) // m * m


@jax.jit
def policy_network_forward(x, w1, b1, w2, b2):
    """Fused PolicyNetwork forward pass as one batch-tiled Pallas kernel.

    x:  (B, input_dim)   float32
    w1: (input_dim, 64)  float32   b1: (1, 64)
    w2: (64, output_dim) float32   b2: (1, output_dim)
    returns: (B, output_dim) float32 softmax probabilities
    """
    batch, input_dim = x.shape
    hidden_dim = w1.shape[1]
    output_dim = w2.shape[1]

    # Tile the batch; pad B up to a multiple of the tile so the last block is
    # full (padded rows produce finite softmax values and are sliced off).
    tile_b = min(_MAX_TILE_B, _round_up(batch, 8))
    padded_b = _round_up(batch, tile_b)
    if padded_b != batch:
        x = jnp.pad(x, ((0, padded_b - batch), (0, 0)))

    out = pl.pallas_call(
        _policy_kernel,
        out_shape=jax.ShapeDtypeStruct((padded_b, output_dim), jnp.float32),
        grid=(pl.cdiv(padded_b, tile_b),),
        in_specs=[
            pl.BlockSpec((tile_b, input_dim), lambda i: (i, 0)),       # x: tiled
            pl.BlockSpec((input_dim, hidden_dim), lambda i: (0, 0)),   # w1: resident
            pl.BlockSpec((1, hidden_dim), lambda i: (0, 0)),           # b1: resident
            pl.BlockSpec((hidden_dim, output_dim), lambda i: (0, 0)),  # w2: resident
            pl.BlockSpec((1, output_dim), lambda i: (0, 0)),           # b2: resident
        ],
        out_specs=pl.BlockSpec((tile_b, output_dim), lambda i: (i, 0)),
        compiler_params=pltpu.CompilerParams(
            dimension_semantics=("parallel",)),
    )(x, w1, b1, w2, b2)

    return out[:batch]


def init_params(key, input_dim, hidden_dim, output_dim):
    """Deterministic PyTorch-style (Kaiming-uniform-ish) Linear init."""
    k1, k2, k3, k4 = jax.random.split(key, 4)
    bound1 = 1.0 / (input_dim ** 0.5)
    bound2 = 1.0 / (hidden_dim ** 0.5)
    w1 = jax.random.uniform(k1, (input_dim, hidden_dim), jnp.float32, -bound1, bound1)
    b1 = jax.random.uniform(k2, (1, hidden_dim), jnp.float32, -bound1, bound1)
    w2 = jax.random.uniform(k3, (hidden_dim, output_dim), jnp.float32, -bound2, bound2)
    b2 = jax.random.uniform(k4, (1, output_dim), jnp.float32, -bound2, bound2)
    return w1, b1, w2, b2


if __name__ == "__main__":
    key = jax.random.PRNGKey(0)
    k_x, k_p = jax.random.split(key)

    # NOTE: real deployments should stack many environments/timesteps so the
    # batch is >= 128-512 rows; tiny batches are pure launch/DMA overhead.
    batch = 2
    input_dim = 16
    output_dim = 8

    x = jax.random.normal(k_x, (batch, input_dim), dtype=jnp.float32)
    w1, b1, w2, b2 = init_params(k_p, input_dim, HIDDEN_DIM, output_dim)

    out = policy_network_forward(x, w1, b1, w2, b2)
    out = jax.block_until_ready(out)

    # Pure-JAX reference (same float32 math; approx reciprocal widens tol a bit).
    h_ref = jnp.maximum(x @ w1 + b1, 0.0)
    ref = jax.nn.softmax(h_ref @ w2 + b2, axis=-1)
    assert out.shape == (batch, output_dim)
    assert jnp.allclose(out, ref, atol=2e-3, rtol=2e-3)
    assert jnp.allclose(jnp.sum(out, axis=-1), 1.0, atol=2e-3)

    print("KERNEL_OK")
</pallas_src>

<mosaic_0001>
module attributes {stable_mosaic.version = 11 : i64} {
  func.func @_policy_kernel(%arg0: i32, %arg1: memref<8x16xf32, #tpu.memory_space<vmem>>, %arg2: memref<16x64xf32, #tpu.memory_space<vmem>>, %arg3: memref<1x64xf32, #tpu.memory_space<vmem>>, %arg4: memref<64x8xf32, #tpu.memory_space<vmem>>, %arg5: memref<1x8xf32, #tpu.memory_space<vmem>>, %arg6: memref<8x8xf32, #tpu.memory_space<vmem>>) attributes {dimension_semantics = [#tpu.dimension_semantics<parallel>], iteration_bounds = array<i64: 1>, scalar_prefetch = 0 : i64, scratch_operands = 0 : i64, tpu.core_type = #tpu.core_type<tc>, window_params = [{transform_indices = @transform_0, window_bounds = array<i64: 8, 16>}, {pipeline_mode = #tpu.pipeline_mode<synchronous>, transform_indices = @transform_1, window_bounds = array<i64: 16, 64>}, {pipeline_mode = #tpu.pipeline_mode<synchronous>, transform_indices = @transform_2, window_bounds = array<i64: 1, 64>}, {pipeline_mode = #tpu.pipeline_mode<synchronous>, transform_indices = @transform_3, window_bounds = array<i64: 64, 8>}, {pipeline_mode = #tpu.pipeline_mode<synchronous>, transform_indices = @transform_4, window_bounds = array<i64: 1, 8>}, {transform_indices = @transform_5, window_bounds = array<i64: 8, 8>}]} {
    %c0 = arith.constant 0 : index
    %c0_0 = arith.constant 0 : index
    %0 = vector.load %arg1[%c0, %c0_0] : memref<8x16xf32, #tpu.memory_space<vmem>>, vector<8x16xf32>
    %c0_1 = arith.constant 0 : index
    %c0_2 = arith.constant 0 : index
    %1 = vector.load %arg2[%c0_1, %c0_2] : memref<16x64xf32, #tpu.memory_space<vmem>>, vector<16x64xf32>
    %cst = arith.constant dense<0.000000e+00> : vector<8x64xf32>
    %2 = tpu.matmul %0, %1, %cst {dimension_numbers = #tpu.dot_dimension_numbers<[1], [0], [0], [1], [0, 0, 1, 1], [], []>} : vector<8x16xf32>, vector<16x64xf32>, vector<8x64xf32> -> vector<8x64xf32>
    %c0_3 = arith.constant 0 : index
    %c0_4 = arith.constant 0 : index
    %3 = vector.load %arg3[%c0_3, %c0_4] : memref<1x64xf32, #tpu.memory_space<vmem>>, vector<1x64xf32>
    %4 = vector.broadcast %3 : vector<1x64xf32> to vector<8x64xf32>
    %5 = arith.addf %2, %4 : vector<8x64xf32>
    %cst_5 = arith.constant 0.000000e+00 : f32
    %6 = vector.broadcast %cst_5 : f32 to vector<8x64xf32>
    %7 = arith.maximumf %5, %6 : vector<8x64xf32>
    %c0_6 = arith.constant 0 : index
    %c0_7 = arith.constant 0 : index
    %8 = vector.load %arg4[%c0_6, %c0_7] : memref<64x8xf32, #tpu.memory_space<vmem>>, vector<64x8xf32>
    %cst_8 = arith.constant dense<0.000000e+00> : vector<8x8xf32>
    %9 = tpu.matmul %7, %8, %cst_8 {dimension_numbers = #tpu.dot_dimension_numbers<[1], [0], [0], [1], [0, 0, 1, 1], [], []>} : vector<8x64xf32>, vector<64x8xf32>, vector<8x8xf32> -> vector<8x8xf32>
    %c0_9 = arith.constant 0 : index
    %c0_10 = arith.constant 0 : index
    %10 = vector.load %arg5[%c0_9, %c0_10] : memref<1x8xf32, #tpu.memory_space<vmem>>, vector<1x8xf32>
    %11 = vector.broadcast %10 : vector<1x8xf32> to vector<8x8xf32>
    %12 = arith.addf %9, %11 : vector<8x8xf32>
    %cst_11 = arith.constant dense<0xFF800000> : vector<8xf32>
    %13 = vector.multi_reduction <maximumf>, %12, %cst_11 [1] : vector<8x8xf32> to vector<8xf32>
    %14 = vector.shape_cast %13 : vector<8xf32> to vector<8x1xf32>
    %15 = vector.broadcast %14 : vector<8x1xf32> to vector<8x8xf32>
    %16 = arith.subf %12, %15 : vector<8x8xf32>
    %17 = math.exp %16 : vector<8x8xf32>
    %cst_12 = arith.constant dense<0.000000e+00> : vector<8xf32>
    %18 = vector.multi_reduction <add>, %17, %cst_12 [1] : vector<8x8xf32> to vector<8xf32>
    %19 = vector.shape_cast %18 : vector<8xf32> to vector<8x1xf32>
    %20 = tpu.reciprocal %19 {approx = true} : vector<8x1xf32> -> vector<8x1xf32>
    %21 = vector.broadcast %20 : vector<8x1xf32> to vector<8x8xf32>
    %22 = arith.mulf %17, %21 : vector<8x8xf32>
    %c0_13 = arith.constant 0 : index
    %c0_14 = arith.constant 0 : index
    %23 = vector.load %arg6[%c0_13, %c0_14] : memref<8x8xf32, #tpu.memory_space<vmem>>, vector<8x8xf32>
    tpu.vector_store %arg6[%c0_13, %c0_14], %22 {strides = array<i32>} : memref<8x8xf32, #tpu.memory_space<vmem>>, vector<8x8xf32>,
    return
  }
  func.func @transform_0(%arg0: i32) -> (i32, i32) {
    %c0_i32 = arith.constant 0 : i32
    %c0_i32_0 = arith.constant 0 : i32
    return %arg0, %c0_i32 : i32, i32
  }
  func.func @transform_1(%arg0: i32) -> (i32, i32) {
    %c0_i32 = arith.constant 0 : i32
    %c0_i32_0 = arith.constant 0 : i32
    %c0_i32_1 = arith.constant 0 : i32
    return %c0_i32, %c0_i32_0 : i32, i32
  }
  func.func @transform_2(%arg0: i32) -> (i32, i32) {
    %c0_i32 = arith.constant 0 : i32
    %c0_i32_0 = arith.constant 0 : i32
    %c0_i32_1 = arith.constant 0 : i32
    return %c0_i32, %c0_i32_0 : i32, i32
  }
  func.func @transform_3(%arg0: i32) -> (i32, i32) {
    %c0_i32 = arith.constant 0 : i32
    %c0_i32_0 = arith.constant 0 : i32
    %c0_i32_1 = arith.constant 0 : i32
    return %c0_i32, %c0_i32_0 : i32, i32
  }
  func.func @transform_4(%arg0: i32) -> (i32, i32) {
    %c0_i32 = arith.constant 0 : i32
    %c0_i32_0 = arith.constant 0 : i32
    %c0_i32_1 = arith.constant 0 : i32
    return %c0_i32, %c0_i32_0 : i32, i32
  }
  func.func @transform_5(%arg0: i32) -> (i32, i32) {
    %c0_i32 = arith.constant 0 : i32
    %c0_i32_0 = arith.constant 0 : i32
    return %arg0, %c0_i32 : i32, i32
  }
}

</mosaic_0001>

<bundles_post_ra>
// kernel: policy_network_forward.1
= control target key start
LH: loop header
LB: loop body
LE: loop exit
PB: predicated region body
PF: predicated region fallthrough
CT: control target
= control target key end

     0   :  { %v275_v0 = vmov 0.0|0.0   ;;  %vm276_vm0 = vmmov 0   ;;  %v277_v3 = vmov 0.0   ;;  %vm30_vm1 = vcmask 130048   ;;  %s353_s1 = inlined_call_operand.vmem [shape: f32[16,64], index: 1, kind: input, shape index: {}]   ;;  %s354_s3 = inlined_call_operand.vmem [shape: f32[64,8], index: 3, kind: input, shape index: {}]   ;;  %s355_s0 = inlined_call_operand.vmem [shape: f32[8,16], index: 0, kind: input, shape index: {}]   ;;  %s356_s2 = inlined_call_operand.vmem [shape: f32[1,64], index: 2, kind: input, shape index: {}]   ;;  %s357_s4 = inlined_call_operand.vmem [shape: f32[1,8], index: 4, kind: input, shape index: {}]   ;;  %s358_s5 = inlined_call_operand.vmem [shape: f32[8,8], index: 5, kind: output, shape index: {}]  }
   0x1   :  { %253 = vmatprep.subr.bf16.mxu0 %v275_v0  ;;  %v21_v1 = vld [vmem:[%s353_s1] sm:$0xff]  ;;  %v22_v2 = vld [vmem:[%s353_s1 + $0x8] sm:$0xff]  ;;  %231 = vmatprep.mubr.msk.f32.mxu0 %vm276_vm0, %v277_v3  ;;  %v107_v7 = vld [vmem:[%s354_s3 + $0x10] sm:$0xff]  ;;  %vm120_vm2 = vcmask 523264   ;;  %vm194_vm3 = vcmask 64512  }
   0x2   :  { %v254_v4 = vpack.c.bf16 %v22_v2, %v21_v1  ;;  %256 = vmatprep.subr.bf16.mxu1 %v275_v0  ;;  %v105_v5 = vld [vmem:[%s354_s3] sm:$0xff]  ;;  %v106_v6 = vld [vmem:[%s354_s3 + $0x8] sm:$0xff]  ;;  %250 = vmatprep.mubr.msk.f32.mxu1 %vm276_vm0, %v277_v3  ;;  %v108_v9 = vld [vmem:[%s354_s3 + $0x18] sm:$0xff] }
   0x3   :  { %v257_v8 = vpack.c.bf16 %v106_v6, %v105_v5  ;;  %v20_v10 = vld [vmem:[%s355_s0] sm:$0xff]  ;;  %v260_v11 = vpack.c.bf16 %v108_v9, %v107_v7  ;;  %v110_v13 = vld [vmem:[%s354_s3 + $0x28] sm:$0xff]  ;;  %v111_v15 = vld [vmem:[%s354_s3 + $0x30] sm:$0xff] }
   0x4   :  { %255 = vmatpush3.bf16.msra.mxu0 %v254_v4  ;;  %v109_v12 = vld [vmem:[%s354_s3 + $0x20] sm:$0xff]  ;;  %v112_v16 = vld [vmem:[%s354_s3 + $0x38] sm:$0xff] }
   0x5   :  { %258 = vmatpush3.bf16.msra.mxu1 %v257_v8  ;;  %v263_v14 = vpack.c.bf16 %v110_v13, %v109_v12  ;;  %v266_v17 = vpack.c.bf16 %v112_v16, %v111_v15  ;;  %v211_v18 = vld [vmem:[%s356_s2] ss:$0 sm:$0xff] }
   0x6   :  { %259 = vmatprep.subr.bf16.mxu1 %v275_v0  ;;  %v213_v23 = vld [vmem:[%s357_s4] ss:$0 sm:$0xff] }
   0x7   :  { %232 = vmatmul.mubr.msk.f32.vlgmr.msra.gmra.mrb[0].mxu0 %vm30_vm1, %v20_v10 }
   0x9   :  { %261 = vmatpush3.bf16.msra.mxu1 %v260_v11 }
   0xa   :  { %262 = vmatprep.subr.bf16.mxu1 %v275_v0 }
   0xd   :  { %264 = vmatpush3.bf16.msra.mxu1 %v263_v14 }
   0xe   :  { %265 = vmatprep.subr.bf16.mxu1 %v275_v0 }
  0x11   :  { %267 = vmatpush3.bf16.msra.mxu1 %v266_v17 }
  0xda   :  { %v100_v19 = vpop.f32.mrb[0].mxu0 }
  0xdb   :  { %v101_v20 = vadd.f32 %v211_v18, %v100_v19  ;;  %v233_v21 = vpop.f32.mrb[1].mxu0 }
  0xdd   :  { %v104_v22 = vmax.f32 %v101_v20, 0.0 }
  0xdf   :  { %251 = vmatmul.mubr.msk.f32.vlgmr.msra.gmra.mrb[0].mxu1 %vm120_vm2, %v104_v22 }
 0x1b2   :  { %v190_v24 = vpop.f32.mrb[0].mxu1 }
 0x1b3   :  { %v191_v25 = vadd.f32 %v213_v23, %v190_v24  ;;  %v252_v26 = vpop.f32.mrb[1].mxu1 }
 0x1b5   :  { %v195_v27 = vsel %vm194_vm3, %v191_v25, -inf }
 0x1b6   :  { %196 = vmax.xlane.f32.xlu0 %v195_v27 }
 0x243   :  { %v197_v28 = vpop.xlane.xlu0 %196 }
 0x244   :  { %v198_v29 = vsub.f32 %v191_v25, %v197_v28 }
 0x246   :  { %v199_v30 = vmul.f32 1.442695, %v198_v29 }
 0x248   :  { %271 = vpow2.f32 %v199_v30 }
 0x252   :  { %v272_v31 = vpop.eup %271 }
 0x253   :  { %v201_v32 = vsel %vm194_vm3, %v272_v31, 0.0 }
 0x254   :  { %202 = vadd.xlane.f32.xlu0 %v201_v32 }
 0x2e1   :  { %v203_v33 = vpop.xlane.xlu0 %202 }
 0x2e2   :  { %273 = vrcp.f32 %v203_v33 }
 0x2ec   :  { %v274_v34 = vpop.eup %273 }
 0x2ed   :  { %v205_v35 = vmul.f32 %v274_v34, %v272_v31 }
 0x2ef   :  { %206 = vst.msk [vmem:[%s358_s5] sm:$0xff] %vm194_vm3, %v205_v35 }

</bundles_post_ra>
